<compile_context>
chip_gen: v7x
topology: tpu7x:2x2x1
jax: 0.10.0
libtpu: 0.0.40
codegen_flags: <defaults>
</compile_context>

<pallas_src>
import jax
import jax.numpy as jnp
from jax.experimental import pallas as pl
from jax.experimental.pallas import tpu as pltpu


def _round_up(x, m):
    return ((x + m - 1) // m) * m


def _chip_config():
    """Per-generation (tm_cap, th_cap, vmem_limit_bytes, is_v7x)."""
    try:
        kind = jax.devices()[0].device_kind.lower()
    except Exception:  # pragma: no cover - defensive
        kind = ""
    if "v5" in kind:
        # v5e: ~240 flops/byte roofline -> tm=512 is plenty; 128 MiB physical VMEM.
        return 512, 512, 100 * 1024 * 1024, False
    if "v6" in kind:
        # v6e: needs tm >~ 650 to be MXU-bound; 128 MiB physical VMEM.
        return 1024, 512, 100 * 1024 * 1024, False
    if "v7" in kind or "7x" in kind:
        # v7x: 64 MiB physical VMEM -> leave headroom; tm=512 already compute-bound.
        return 512, 512, 48 * 1024 * 1024, True
    # Unknown chip: conservative settings that fit any generation's VMEM.
    return 512, 512, 48 * 1024 * 1024, False


def _ffn_kernel(x_ref, w1_ref, b1_ref, w2_ref, b2_ref, o_ref, acc_ref):
    # x_ref:  (tm, Ep)  bf16 row tile (resident across the k/H axis)
    # w1_ref: (Ep, th)  bf16 first-layer weight column tile
    # b1_ref: (1,  th)  f32
    # w2_ref: (th, Ep)  bf16 second-layer weight row tile
    # b2_ref: (1,  Ep)  f32
    # o_ref:  (tm, Ep)  output tile (written on last k step)
    # acc_ref:(tm, Ep)  f32 accumulator scratch
    k = pl.program_id(1)

    @pl.when(k == 0)
    def _():
        acc_ref[...] = jnp.zeros_like(acc_ref)

    x = x_ref[...]
    h = jnp.dot(x, w1_ref[...], preferred_element_type=jnp.float32) + b1_ref[...]
    # GELU (tanh approximation): 0.5*h*(1 + tanh(c*h*(1 + 0.044715*h^2)))
    c = jnp.float32(0.7978845608028654)  # sqrt(2/pi)
    t = c * h * (1.0 + 0.044715 * (h * h))
    g = 0.5 * h * (1.0 + jnp.tanh(t))
    acc_ref[...] += jnp.dot(
        g.astype(w2_ref.dtype), w2_ref[...], preferred_element_type=jnp.float32
    )

    @pl.when(k == pl.num_programs(1) - 1)
    def _():
        o_ref[...] = (acc_ref[...] + b2_ref[...]).astype(o_ref.dtype)


def feed_forward(x, w1, b1, w2, b2, *, tm=None, th=None,
                 compute_dtype=jnp.bfloat16, out_dtype=None):
    """x: (B, S, E). w1: (E, H), b1: (H,), w2: (H, E), b2: (E,)."""
    B, S, E = x.shape
    H = w1.shape[1]
    M = B * S
    if out_dtype is None:
        out_dtype = x.dtype

    tm_cap, th_cap, vmem_limit, is_v7x = _chip_config()
    # Adaptive tiles: big enough to feed the MXU past the HBM roofline on this
    # generation, collapsing for toy sizes.
    if tm is None:
        tm = min(tm_cap, _round_up(M, 8))
    if th is None:
        th = min(th_cap, _round_up(H, 128))

    Mp = _round_up(M, tm)           # rows padded to a multiple of the row tile
    Ep = _round_up(E, 128)          # lane-dense last dim (unmasked stores)
    Hp = _round_up(H, th)           # hidden dim padded to a multiple of th

    # v7x has 2 TensorCores per chip: keep the "parallel" row grid even so
    # neither core idles. Only pay the extra padded tile when there are >= 2.
    n_row_tiles = Mp // tm
    if is_v7x and n_row_tiles >= 2 and n_row_tiles % 2 == 1:
        Mp += tm

    # ---- Wrapper-side layout plumbing (only copy when actually misaligned). ----
    # For weight-stationary workloads, hoist these casts/pads outside the step.
    xm = x.reshape(M, E).astype(compute_dtype)
    if Mp == M and Ep == E:
        x2 = xm
    else:
        x2 = jnp.zeros((Mp, Ep), compute_dtype).at[:M, :E].set(xm)

    if Ep == E and Hp == H:
        w1p = w1.astype(compute_dtype)
        w2p = w2.astype(compute_dtype)
        b1p = b1.astype(jnp.float32).reshape(1, Hp)
        b2p = b2.astype(jnp.float32).reshape(1, Ep)
    else:
        w1p = jnp.zeros((Ep, Hp), compute_dtype).at[:E, :H].set(
            w1.astype(compute_dtype))
        w2p = jnp.zeros((Hp, Ep), compute_dtype).at[:H, :E].set(
            w2.astype(compute_dtype))
        b1p = jnp.zeros((1, Hp), jnp.float32).at[0, :H].set(b1.astype(jnp.float32))
        b2p = jnp.zeros((1, Ep), jnp.float32).at[0, :E].set(b2.astype(jnp.float32))

    grid = (Mp // tm, Hp // th)     # rows parallel, hidden reduction last

    bytes_accessed = (
        x2.size * x2.dtype.itemsize
        + w1p.size * w1p.dtype.itemsize + b1p.size * 4
        + w2p.size * w2p.dtype.itemsize + b2p.size * 4
        + Mp * Ep * jnp.dtype(out_dtype).itemsize
    )
    cost = pl.CostEstimate(
        flops=4 * M * E * H,          # two M x E x H matmuls
        transcendentals=M * H,        # one tanh per hidden activation
        bytes_accessed=bytes_accessed,
    )

    out = pl.pallas_call(
        _ffn_kernel,
        out_shape=jax.ShapeDtypeStruct((Mp, Ep), out_dtype),
        grid_spec=pltpu.PrefetchScalarGridSpec(
            num_scalar_prefetch=0,
            grid=grid,
            in_specs=[
                pl.BlockSpec((tm, Ep), lambda i, k: (i, 0)),   # x rows (resident over k)
                pl.BlockSpec((Ep, th), lambda i, k: (0, k)),   # w1 column tile
                pl.BlockSpec((1, th), lambda i, k: (0, k)),    # b1 tile
                pl.BlockSpec((th, Ep), lambda i, k: (k, 0)),   # w2 row tile
                pl.BlockSpec((1, Ep), lambda i, k: (0, 0)),    # b2 (full)
            ],
            out_specs=pl.BlockSpec((tm, Ep), lambda i, k: (i, 0)),
            scratch_shapes=[pltpu.VMEM((tm, Ep), jnp.float32)],
        ),
        compiler_params=pltpu.CompilerParams(
            dimension_semantics=("parallel", "arbitrary"),
            vmem_limit_bytes=vmem_limit,
        ),
        cost_estimate=cost,
    )(x2, w1p, b1p, w2p, b2p)

    return out[:M, :E].reshape(B, S, E).astype(out_dtype)


def _reference(x, w1, b1, w2, b2):
    h = jnp.einsum("bse,eh->bsh", x, w1) + b1
    c = jnp.sqrt(2.0 / jnp.pi)
    g = 0.5 * h * (1.0 + jnp.tanh(c * (h + 0.044715 * h ** 3)))
    return jnp.einsum("bsh,he->bse", g, w2) + b2


if __name__ == "__main__":
    # Config: emb_dim=32, expansion_rate=4 -> hidden=128
    B, S, E = 2, 8, 32
    H = 4 * E

    key = jax.random.PRNGKey(0)
    kx, k1, k2, k3, k4 = jax.random.split(key, 5)

    x = jax.random.normal(kx, (B, S, E), dtype=jnp.float32)
    # nn.Linear params, stored already transposed as (in, out) for row-major matmul.
    w1 = jax.random.normal(k1, (E, H), dtype=jnp.float32) * 0.02
    b1 = jax.random.normal(k2, (H,), dtype=jnp.float32) * 0.02
    w2 = jax.random.normal(k3, (H, E), dtype=jnp.float32) * 0.02
    b2 = jax.random.normal(k4, (E,), dtype=jnp.float32) * 0.02

    out = feed_forward(x, w1, b1, w2, b2)
    out = jax.block_until_ready(out)

    ref = _reference(x, w1, b1, w2, b2)
    assert out.shape == (B, S, E)
    # bf16 matmul inputs with f32 accumulation -> looser tolerance than pure f32.
    err = float(jnp.max(jnp.abs(out - ref)))
    assert jnp.allclose(out, ref, atol=2e-2, rtol=2e-2), f"max abs err {err}"

    print("KERNEL_OK")
</pallas_src>

<mosaic_0001>
module attributes {stable_mosaic.version = 11 : i64} {
  func.func @_ffn_kernel(%arg0: i32, %arg1: i32, %arg2: memref<16x128xbf16, #tpu.memory_space<vmem>>, %arg3: memref<128x128xbf16, #tpu.memory_space<vmem>>, %arg4: memref<1x128xf32, #tpu.memory_space<vmem>>, %arg5: memref<128x128xbf16, #tpu.memory_space<vmem>>, %arg6: memref<1x128xf32, #tpu.memory_space<vmem>>, %arg7: memref<16x128xf32, #tpu.memory_space<vmem>>, %arg8: memref<16x128xf32, #tpu.memory_space<vmem>>) attributes {dimension_semantics = [#tpu.dimension_semantics<parallel>, #tpu.dimension_semantics<arbitrary>], iteration_bounds = array<i64: 1, 1>, scalar_prefetch = 0 : i64, scratch_operands = 1 : i64, tpu.core_type = #tpu.core_type<tc>, window_params = [{transform_indices = @transform_0, window_bounds = array<i64: 16, 128>}, {transform_indices = @transform_1, window_bounds = array<i64: 128, 128>}, {transform_indices = @transform_2, window_bounds = array<i64: 1, 128>}, {transform_indices = @transform_3, window_bounds = array<i64: 128, 128>}, {pipeline_mode = #tpu.pipeline_mode<synchronous>, transform_indices = @transform_4, window_bounds = array<i64: 1, 128>}, {transform_indices = @transform_5, window_bounds = array<i64: 16, 128>}]} {
    %c0_i32 = arith.constant 0 : i32
    %0 = arith.cmpi eq, %arg1, %c0_i32 : i32
    %1 = arith.extui %0 : i1 to i32
    %c0_i32_0 = arith.constant 0 : i32
    %2 = arith.cmpi ne, %1, %c0_i32_0 : i32
    scf.if %2 {
      %cst_20 = arith.constant 0.000000e+00 : f32
      %32 = vector.broadcast %cst_20 : f32 to vector<16x128xf32>
      %c0_21 = arith.constant 0 : index
      %c0_22 = arith.constant 0 : index
      %33 = vector.load %arg8[%c0_21, %c0_22] : memref<16x128xf32, #tpu.memory_space<vmem>>, vector<16x128xf32>
      tpu.vector_store %arg8[%c0_21, %c0_22], %32 {strides = array<i32>} : memref<16x128xf32, #tpu.memory_space<vmem>>, vector<16x128xf32>,
    } else {
    }
    %c0 = arith.constant 0 : index
    %c0_1 = arith.constant 0 : index
    %3 = vector.load %arg2[%c0, %c0_1] : memref<16x128xbf16, #tpu.memory_space<vmem>>, vector<16x128xbf16>
    %c0_2 = arith.constant 0 : index
    %c0_3 = arith.constant 0 : index
    %4 = vector.load %arg3[%c0_2, %c0_3] : memref<128x128xbf16, #tpu.memory_space<vmem>>, vector<128x128xbf16>
    %cst = arith.constant dense<0.000000e+00> : vector<16x128xf32>
    %5 = tpu.matmul %3, %4, %cst {dimension_numbers = #tpu.dot_dimension_numbers<[1], [0], [0], [1], [0, 0, 1, 1], [], []>} : vector<16x128xbf16>, vector<128x128xbf16>, vector<16x128xf32> -> vector<16x128xf32>
    %c0_4 = arith.constant 0 : index
    %c0_5 = arith.constant 0 : index
    %6 = vector.load %arg4[%c0_4, %c0_5] : memref<1x128xf32, #tpu.memory_space<vmem>>, vector<1x128xf32>
    %7 = vector.broadcast %6 : vector<1x128xf32> to vector<16x128xf32>
    %8 = arith.addf %5, %7 : vector<16x128xf32>
    %cst_6 = arith.constant 0.797884583 : f32
    %9 = vector.broadcast %cst_6 : f32 to vector<16x128xf32>
    %10 = arith.mulf %9, %8 : vector<16x128xf32>
    %11 = arith.mulf %8, %8 : vector<16x128xf32>
    %cst_7 = arith.constant 4.471500e-02 : f32
    %12 = vector.broadcast %cst_7 : f32 to vector<16x128xf32>
    %13 = arith.mulf %12, %11 : vector<16x128xf32>
    %cst_8 = arith.constant 1.000000e+00 : f32
    %14 = vector.broadcast %cst_8 : f32 to vector<16x128xf32>
    %15 = arith.addf %14, %13 : vector<16x128xf32>
    %16 = arith.mulf %10, %15 : vector<16x128xf32>
    %cst_9 = arith.constant 5.000000e-01 : f32
    %17 = vector.broadcast %cst_9 : f32 to vector<16x128xf32>
    %18 = arith.mulf %17, %8 : vector<16x128xf32>
    %19 = math.tanh %16 : vector<16x128xf32>
    %cst_10 = arith.constant 1.000000e+00 : f32
    %20 = vector.broadcast %cst_10 : f32 to vector<16x128xf32>
    %21 = arith.addf %20, %19 : vector<16x128xf32>
    %22 = arith.mulf %18, %21 : vector<16x128xf32>
    %c0_11 = arith.constant 0 : index
    %c0_12 = arith.constant 0 : index
    %23 = vector.load %arg8[%c0_11, %c0_12] : memref<16x128xf32, #tpu.memory_space<vmem>>, vector<16x128xf32>
    %24 = arith.truncf %22 : vector<16x128xf32> to vector<16x128xbf16>
    %c0_13 = arith.constant 0 : index
    %c0_14 = arith.constant 0 : index
    %25 = vector.load %arg5[%c0_13, %c0_14] : memref<128x128xbf16, #tpu.memory_space<vmem>>, vector<128x128xbf16>
    %cst_15 = arith.constant dense<0.000000e+00> : vector<16x128xf32>
    %26 = tpu.matmul %24, %25, %cst_15 {dimension_numbers = #tpu.dot_dimension_numbers<[1], [0], [0], [1], [0, 0, 1, 1], [], []>} : vector<16x128xbf16>, vector<128x128xbf16>, vector<16x128xf32> -> vector<16x128xf32>
    %27 = arith.addf %23, %26 : vector<16x128xf32>
    %c0_16 = arith.constant 0 : index
    %c0_17 = arith.constant 0 : index
    %28 = vector.load %arg8[%c0_16, %c0_17] : memref<16x128xf32, #tpu.memory_space<vmem>>, vector<16x128xf32>
    tpu.vector_store %arg8[%c0_16, %c0_17], %27 {strides = array<i32>} : memref<16x128xf32, #tpu.memory_space<vmem>>, vector<16x128xf32>,
    %c0_i32_18 = arith.constant 0 : i32
    %29 = arith.cmpi eq, %arg1, %c0_i32_18 : i32
    %30 = arith.extui %29 : i1 to i32
    %c0_i32_19 = arith.constant 0 : i32
    %31 = arith.cmpi ne, %30, %c0_i32_19 : i32
    scf.if %31 {
      %c0_20 = arith.constant 0 : index
      %c0_21 = arith.constant 0 : index
      %32 = vector.load %arg8[%c0_20, %c0_21] : memref<16x128xf32, #tpu.memory_space<vmem>>, vector<16x128xf32>
      %c0_22 = arith.constant 0 : index
      %c0_23 = arith.constant 0 : index
      %33 = vector.load %arg6[%c0_22, %c0_23] : memref<1x128xf32, #tpu.memory_space<vmem>>, vector<1x128xf32>
      %34 = vector.broadcast %33 : vector<1x128xf32> to vector<16x128xf32>
      %35 = arith.addf %32, %34 : vector<16x128xf32>
      %c0_24 = arith.constant 0 : index
      %c0_25 = arith.constant 0 : index
      %36 = vector.load %arg7[%c0_24, %c0_25] : memref<16x128xf32, #tpu.memory_space<vmem>>, vector<16x128xf32>
      tpu.vector_store %arg7[%c0_24, %c0_25], %35 {strides = array<i32>} : memref<16x128xf32, #tpu.memory_space<vmem>>, vector<16x128xf32>,
    } else {
    }
    return
  }
  func.func @transform_0(%arg0: i32, %arg1: i32) -> (i32, i32) {
    %c0_i32 = arith.constant 0 : i32
    %c0_i32_0 = arith.constant 0 : i32
    return %arg0, %c0_i32 : i32, i32
  }
  func.func @transform_1(%arg0: i32, %arg1: i32) -> (i32, i32) {
    %c0_i32 = arith.constant 0 : i32
    %c0_i32_0 = arith.constant 0 : i32
    return %c0_i32, %arg1 : i32, i32
  }
  func.func @transform_2(%arg0: i32, %arg1: i32) -> (i32, i32) {
    %c0_i32 = arith.constant 0 : i32
    %c0_i32_0 = arith.constant 0 : i32
    return %c0_i32, %arg1 : i32, i32
  }
  func.func @transform_3(%arg0: i32, %arg1: i32) -> (i32, i32) {
    %c0_i32 = arith.constant 0 : i32
    %c0_i32_0 = arith.constant 0 : i32
    return %arg1, %c0_i32 : i32, i32
  }
  func.func @transform_4(%arg0: i32, %arg1: i32) -> (i32, i32) {
    %c0_i32 = arith.constant 0 : i32
    %c0_i32_0 = arith.constant 0 : i32
    %c0_i32_1 = arith.constant 0 : i32
    return %c0_i32, %c0_i32_0 : i32, i32
  }
  func.func @transform_5(%arg0: i32, %arg1: i32) -> (i32, i32) {
    %c0_i32 = arith.constant 0 : i32
    %c0_i32_0 = arith.constant 0 : i32
    return %arg0, %c0_i32 : i32, i32
  }
}

</mosaic_0001>

<bundles_post_ra>
// kernel: tpu_custom_call.1
= control target key start
LH: loop header
LB: loop body
LE: loop exit
PB: predicated region body
PF: predicated region fallthrough
CT: control target
= control target key end

     0   :  { %10 = vsyncpa [#allocation4], 0  ;;  %s665_s0 = inlined_call_operand.hbm [shape: bf16[16,128], index: 0, kind: input, shape index: {}]   ;;  %s666_s1 = inlined_call_operand.hbm [shape: bf16[128,128], index: 1, kind: input, shape index: {}]   ;;  %s667_s2 = inlined_call_operand.vmem [shape: f32[1,128], index: 2, kind: input, shape index: {}]   ;;  %s668_s3 = inlined_call_operand.hbm [shape: bf16[128,128], index: 3, kind: input, shape index: {}]   ;;  %s669_s4 = inlined_call_operand.vmem [shape: f32[1,128], index: 4, kind: input, shape index: {}]   ;;  %s670_s5 = inlined_call_operand.hbm [shape: f32[16,128], index: 5, kind: output, shape index: {}]  }
   0x1   :  { %11 = vsyncpa [#allocation7], 0 }
   0x2   :  { %12 = vsyncpa [#allocation5], 0  ;;  %s555_s18 = smov [#allocation6]   ;;  %s556_s20 = smov [#allocation3]  }
   0x3   :  { %s30_s19 = sshll.u32 %s555_s18, 4  ;;  %s18_s21 = sshll.u32 %s556_s20, 4  ;;  %s31_s19 = int_to_ptr.vmem [resolvable:$true] %s30_s19  ;;  %s595_s21 = int_to_ptr.vmem [resolvable:$true] %s18_s21 }
   0x4   :  { %s461_s24 = scalar_lea.hbm %s666_s1, 1024 }
   0x5   :  { %p462_p0 = scmp.ne.s32.totalorder %s666_s1, %s461_s24  ;;  %p465_p1 = scmp.lt.u32.totalorder %s461_s24, %s666_s1 }
   0x7   :  { %p467_p2 = pnand %p465_p1, %p462_p0 }
   0x9   :  { %470 = shalt.err (!%p467_p2)
}
   0xa   :  { %s471_s29 = scalar_lea.vmem %s31_s19, 1024  ;;  %p476_p4 = scmp.lt.s32.totalorder %s31_s19, %s31_s19 }
   0xb   :  { %p472_p3 = scmp.ne.s32.totalorder %s31_s19, %s471_s29  ;;  %p477_p5 = scmp.lt.s32.totalorder %s471_s29, %s471_s29 }
   0xd   :  { %p478_p6 = por %p477_p5, %p476_p4 }
   0xf   :  { %p479_p7 = pnand %p478_p6, %p472_p3 }
  0x11   :  { %482 = shalt.err (!%p479_p7)
}
  0x12   :  { %s557_s30 = smov 64   ;;  %s558_s6 = smov 4  }
  0x13   :  { %36 = dma.hbm_to_vmem [thread:$0]  %s666_s1, 1024, %s31_s19, [#allocation7], %s557_s30, %s557_s30, %s558_s6  }
  0x14   :  { %s483_s11 = scalar_lea.hbm %s665_s0, 128 }
  0x15   :  { %p484_p8 = scmp.ne.s32.totalorder %s665_s0, %s483_s11  ;;  %p487_p9 = scmp.lt.u32.totalorder %s483_s11, %s665_s0 }
  0x17   :  { %p489_p10 = pnand %p487_p9, %p484_p8 }
  0x19   :  { %492 = shalt.err (!%p489_p10)
}
  0x1a   :  { %s493_s16 = scalar_lea.vmem %s595_s21, 128  ;;  %p498_p12 = scmp.lt.s32.totalorder %s595_s21, %s595_s21 }
  0x1b   :  { %p494_p11 = scmp.ne.s32.totalorder %s595_s21, %s493_s16  ;;  %p499_p13 = scmp.lt.s32.totalorder %s493_s16, %s493_s16 }
  0x1d   :  { %p500_p0 = por %p499_p13, %p498_p12 }
  0x1f   :  { %p501_p1 = pnand %p500_p0, %p494_p11 }
  0x21   :  { %504 = shalt.err (!%p501_p1)
}
  0x22   :  { %24 = dma.hbm_to_vmem [thread:$0]  %s665_s0, 128, %s595_s21, [#allocation4], %s557_s30, %s557_s30, %s558_s6  }
  0x23   :  { %s559_s18 = smov [#allocation8]   ;;  %s505_s23 = scalar_lea.hbm %s668_s3, 1024 }
  0x24   :  { %s44_s19 = sshll.u32 %s559_s18, 4  ;;  %p506_p2 = scmp.ne.s32.totalorder %s668_s3, %s505_s23  ;;  %s45_s19 = int_to_ptr.vmem [resolvable:$true] %s44_s19 }
  0x25   :  { %p509_p3 = scmp.lt.u32.totalorder %s505_s23, %s668_s3 }
  0x27   :  { %p511_p4 = pnand %p509_p3, %p506_p2 }
  0x29   :  { %514 = shalt.err (!%p511_p4)
}
  0x2a   :  { %s515_s28 = scalar_lea.vmem %s45_s19, 1024  ;;  %p520_p6 = scmp.lt.s32.totalorder %s45_s19, %s45_s19 }
  0x2b   :  { %p516_p5 = scmp.ne.s32.totalorder %s45_s19, %s515_s28  ;;  %p521_p7 = scmp.lt.s32.totalorder %s515_s28, %s515_s28 }
  0x2d   :  { %p522_p8 = por %p521_p7, %p520_p6 }
  0x2f   :  { %p523_p9 = pnand %p522_p8, %p516_p5 }
  0x31   :  { %526 = shalt.err (!%p523_p9)
}
  0x32   :  { %50 = dma.hbm_to_vmem [thread:$0]  %s668_s3, 1024, %s45_s19, [#allocation7], %s557_s30, %s557_s30, %s558_s6  }
  0x33   :  { %549 = dma.done.wait [#allocation4], 128  }
  0x34   :  { %550 = vsyncadd [#allocation4], 4294967168 }
  0x35   :  { %551 = dma.done.wait [#allocation7], 2048  }
  0x36   :  { %552 = vsyncadd [#allocation7], 4294965248  ;;  %v560_v0 = vmov 0.0   ;;  %vm561_vm0 = vmmov 0   ;;  %v440_v1 = vld [vmem:[#allocation6] sm:$0xff]   ;;  %v441_v2 = vld [vmem:[#allocation6 + $0x8] sm:$0xff]  }
  0x37   :  { %390 = vmatprep.subr.bf16.mxu0 %v560_v0  ;;  %406 = vmatprep.mubr.msk.bf16.mxu0 %vm561_vm0, %v560_v0  ;;  %v442_v3 = vld [vmem:[#allocation6 + $0x10] sm:$0xff]   ;;  %v449_v4 = vld [vmem:[#allocation8] sm:$0xff]   ;;  %v443_v5 = vld [vmem:[#allocation6 + $0x18] sm:$0xff]   ;;  %s562_s6 = smov [#allocation9]  }
  0x38   :  { %410 = vmatprep.subr.bf16.mxu1 %v560_v0  ;;  %426 = vmatprep.mubr.msk.bf16.mxu1 %vm561_vm0, %v560_v0  ;;  %v444_v6 = vld [vmem:[#allocation6 + $0x20] sm:$0xff]   ;;  %v445_v7 = vld [vmem:[#allocation6 + $0x28] sm:$0xff]   ;;  %v446_v8 = vld [vmem:[#allocation6 + $0x30] sm:$0xff]   ;;  %s340_s7 = sshll.u32 %s562_s6, 4  ;;  %s341_s7 = int_to_ptr.vmem [resolvable:$true] %s340_s7 }
  0x39   :  { %391 = vmatpush3.bf16.msra.mxu0 %v440_v1  ;;  %411 = vmatpush3.bf16.msra.mxu1 %v449_v4  ;;  %v447_v9 = vld [vmem:[#allocation6 + $0x38] sm:$0xff]   ;;  %v450_v11 = vld [vmem:[#allocation8 + $0x8] sm:$0xff]   ;;  %v451_v12 = vld [vmem:[#allocation8 + $0x10] sm:$0xff]   ;;  %s527_s8 = scalar_lea.vmem %s341_s7, 256  ;;  %p532_p11 = scmp.lt.s32.totalorder %s341_s7, %s341_s7 }
  0x3a   :  { %392 = vmatprep.subr.bf16.mxu0 %v560_v0  ;;  %412 = vmatprep.subr.bf16.mxu1 %v560_v0  ;;  %v448_v10 = vld [vmem:[#allocation3] sm:$0xff]   ;;  %v453_v14 = vld [vmem:[#allocation8 + $0x20] sm:$0xff]   ;;  %v454_v15 = vld [vmem:[#allocation8 + $0x28] sm:$0xff]   ;;  %p528_p10 = scmp.ne.s32.totalorder %s341_s7, %s527_s8  ;;  %p533_p12 = scmp.lt.s32.totalorder %s527_s8, %s527_s8 }
  0x3b   :  { %v452_v13 = vld [vmem:[#allocation8 + $0x18] sm:$0xff]   ;;  %v455_v16 = vld [vmem:[#allocation8 + $0x30] sm:$0xff]  }
  0x3c   :  { %v456_v17 = vld [vmem:[#allocation8 + $0x38] sm:$0xff]   ;;  %p534_p13 = por %p533_p12, %p532_p11 }
  0x3d   :  { %393 = vmatpush3.bf16.msra.mxu0 %v441_v2  ;;  %413 = vmatpush3.bf16.msra.mxu1 %v450_v11  ;;  %v353_v18 = vld [vmem:[%s667_s2] ss:$0 sm:$0xff] }
  0x3e   :  { %394 = vmatprep.subr.bf16.mxu0 %v560_v0  ;;  %414 = vmatprep.subr.bf16.mxu1 %v560_v0  ;;  %v371_v44 = vld [vmem:[%s669_s4] ss:$0 sm:$0xff]  ;;  %p535_p0 = pnand %p534_p13, %p528_p10 }
  0x41   :  { %395 = vmatpush3.bf16.msra.mxu0 %v442_v3  ;;  %415 = vmatpush3.bf16.msra.mxu1 %v451_v12 }
  0x42   :  { %396 = vmatprep.subr.bf16.mxu0 %v560_v0  ;;  %416 = vmatprep.subr.bf16.mxu1 %v560_v0 }
  0x45   :  { %397 = vmatpush3.bf16.msra.mxu0 %v443_v5  ;;  %417 = vmatpush3.bf16.msra.mxu1 %v452_v13 }
  0x46   :  { %398 = vmatprep.subr.bf16.mxu0 %v560_v0  ;;  %418 = vmatprep.subr.bf16.mxu1 %v560_v0 }
  0x49   :  { %399 = vmatpush3.bf16.msra.mxu0 %v444_v6  ;;  %419 = vmatpush3.bf16.msra.mxu1 %v453_v14 }
  0x4a   :  { %400 = vmatprep.subr.bf16.mxu0 %v560_v0  ;;  %420 = vmatprep.subr.bf16.mxu1 %v560_v0 }
  0x4d   :  { %401 = vmatpush3.bf16.msra.mxu0 %v445_v7  ;;  %421 = vmatpush3.bf16.msra.mxu1 %v454_v15 }
  0x4e   :  { %402 = vmatprep.subr.bf16.mxu0 %v560_v0  ;;  %422 = vmatprep.subr.bf16.mxu1 %v560_v0 }
  0x51   :  { %403 = vmatpush3.bf16.msra.mxu0 %v446_v8  ;;  %423 = vmatpush3.bf16.msra.mxu1 %v455_v16 }
  0x52   :  { %404 = vmatprep.subr.bf16.mxu0 %v560_v0  ;;  %424 = vmatprep.subr.bf16.mxu1 %v560_v0 }
  0x55   :  { %405 = vmatpush3.bf16.msra.mxu0 %v447_v9  ;;  %425 = vmatpush3.bf16.msra.mxu1 %v456_v17 }
  0x58   :  { %407 = vmatmul.mubr.bf16.vlgmr.msra.gmra.mrb[0].mxu0 %v448_v10 }
 0x12b   :  { %v182_v19 = vpop.f32.mrb[0].mxu0 }
 0x12c   :  { %v183_v20 = vadd.f32 %v353_v18, %v182_v19  ;;  %v408_v21 = vpop.f32.mrb[1].mxu0 }
 0x12d   :  { %v185_v22 = vpop.f32.mrb[2].mxu0 }
 0x12e   :  { %v191_v23 = vmul.f32 %v183_v20, %v183_v20  ;;  %v186_v24 = vadd.f32 %v353_v18, %v185_v22  ;;  %v409_v25 = vpop.f32.mrb[3].mxu0  ;;  %v189_v28 = vmul.f32 0.7978846, %v183_v20  ;;  %v199_v38 = vmul.f32 0.5, %v183_v20 }
 0x130   :  { %v193_v26 = vmul.f32 0.044715, %v191_v23  ;;  %v192_v27 = vmul.f32 %v186_v24, %v186_v24  ;;  %v190_v32 = vmul.f32 0.7978846, %v186_v24  ;;  %v200_v39 = vmul.f32 0.5, %v186_v24 }
 0x132   :  { %v195_v29 = vadd.f32 1.0, %v193_v26  ;;  %v194_v30 = vmul.f32 0.044715, %v192_v27 }
 0x134   :  { %v197_v31 = vmul.f32 %v195_v29, %v189_v28  ;;  %v196_v33 = vadd.f32 1.0, %v194_v30 }
 0x136   :  { %457 = vtanh.f32 %v197_v31  ;;  %v198_v34 = vmul.f32 %v196_v33, %v190_v32 }
 0x138   :  { %459 = vtanh.f32 %v198_v34 }
 0x140   :  { %v458_v35 = vpop.eup %457 }
 0x141   :  { %v203_v36 = vadd.f32 1.0, %v458_v35 }
 0x142   :  { %v460_v37 = vpop.eup %459 }
 0x143   :  { %v204_v40 = vadd.f32 1.0, %v460_v37  ;;  %v205_v41 = vmul.f32 %v203_v36, %v199_v38 }
 0x145   :  { %v206_v42 = vmul.f32 %v204_v40, %v200_v39 }
 0x147   :  { %v209_v43 = vpack.c.bf16 %v206_v42, %v205_v41 }
 0x149   :  { %427 = vmatmul.mubr.bf16.vlgmr.msra.gmra.mrb[0].mxu1 %v209_v43 }
 0x21c   :  { %v308_v45 = vpop.f32.mrb[0].mxu1 }
 0x21d   :  { %v331_v46 = vadd.f32 %v371_v44, %v308_v45  ;;  %v428_v47 = vpop.f32.mrb[1].mxu1 }
 0x21e   :  { %v311_v48 = vpop.f32.mrb[2].mxu1 }
 0x21f   :  { %333 = vst [vmem:[#allocation9] sm:$0xff] %v331_v46  ;;  %v332_v49 = vadd.f32 %v371_v44, %v311_v48  ;;  %v429_v50 = vpop.f32.mrb[3].mxu1 }
 0x221   :  { %334 = vst [vmem:[#allocation9 + $0x8] sm:$0xff] %v332_v49 }
 0x222   :  { %538 = shalt.err (!%p535_p0)
}
 0x223   :  { %s539_s10 = scalar_lea.hbm %s670_s5, 256 }
 0x224   :  { %p540_p1 = scmp.ne.s32.totalorder %s670_s5, %s539_s10  ;;  %p543_p2 = scmp.lt.u32.totalorder %s539_s10, %s670_s5 }
 0x226   :  { %p545_p3 = pnand %p543_p2, %p540_p1 }
 0x228   :  { %548 = shalt.err (!%p545_p3)
}
 0x229   :  { %s563_s15 = smov 128   ;;  %s564_s16 = smov 8  }
 0x22a   :  { %346 = dma.vmem_to_hbm [thread:$0]  %s341_s7, 256, %s670_s5, [#allocation5], %s563_s15, %s563_s15, %s564_s16  }
 0x22b   :  { %553 = dma.done.wait [#allocation5], 256  }
 0x22c   :  { %554 = vsyncadd [#allocation5], 4294967040 }
 0x22d   :  { %350 = vsyncpa [#allocation4], 1 }
 0x22e   :  { %351 = vsyncpa [#allocation7], 1 }
 0x22f   :  { %352 = vsyncpa [#allocation5], 1 }

</bundles_post_ra>
